<compile_context>
chip_gen: v6e
topology: v6e:2x2x1
jax: 0.10.0
libtpu: 0.0.40
codegen_flags: <defaults>
</compile_context>

<pallas_src>
import jax
import jax.numpy as jnp
from jax.experimental import pallas as pl
from jax.experimental.pallas import tpu as pltpu


def _chomp_copy_kernel(x_ref, o_ref):
    # x_ref / o_ref: identical (R_tile, T_tile) VMEM tiles. Pure copy; Pallas
    # edge-block masking drops the lanes beyond L_out on the store side, so
    # padded input lanes never reach the real output.
    o_ref[...] = x_ref[...]


def _pick_tiles(rows: int, l_out: int, itemsize: int):
    """Chip-aware (row, lane) tile sizes for a pure-copy kernel."""
    # Lane (time) tile: multiple of 128, capped so a single buffer is a few MiB.
    t_tile = min(2048, pl.cdiv(l_out, 128) * 128)

    # Per-chip VMEM budget for the double-buffered (in + out) working set.
    try:
        vmem_bytes = pltpu.get_tpu_info().vmem_capacity_bytes
    except Exception:  # conservative fallback if the query is unavailable
        vmem_bytes = 64 * 1024 * 1024
    # Keep 2 buffers x (in_tile + out_tile) comfortably under the scoped-VMEM
    # default on every chip (16 MiB v5e, 32 MiB v6e/v7x).
    budget = min(vmem_bytes // 8, 12 * 1024 * 1024)

    # footprint ~= 2 (double buffer) * 2 (in + out) * R * T * itemsize
    r_cap = max(1, budget // (4 * t_tile * itemsize))

    # Sublane packing: 8 rows for f32, 16 for bf16, 32 for int8/fp8.
    sublane = max(8, 32 // max(itemsize, 1))
    if rows <= r_cap:
        r_tile = rows  # block equal to full dim is always legal
    else:
        r_tile = max(sublane, (r_cap // sublane) * sublane)
    return r_tile, t_tile


def chomp1d(x: jax.Array, chomp_size: int) -> jax.Array:
    """Pallas equivalent of Chomp1d.forward: x[:, :, :-chomp_size]."""
    assert x.ndim == 3, "expected (batch, channels, length)"
    assert chomp_size >= 0

    B, C, L = x.shape
    # PyTorch x[:, :, :-chomp] semantics: chomp_size == 0 gives an empty time
    # axis (":-0" == ":0"); chomp_size >= L also gives an empty result.
    l_out = L - chomp_size if 0 < chomp_size < L else 0
    if l_out == 0:
        return x[:, :, :0]

    rows = B * C
    x2 = x.reshape(rows, L)  # metadata-only reshape for row-major (B, C, L)

    itemsize = jnp.dtype(x.dtype).itemsize
    r_tile, t_tile = _pick_tiles(rows, l_out, itemsize)
    grid = (pl.cdiv(rows, r_tile), pl.cdiv(l_out, t_tile))

    out2 = pl.pallas_call(
        _chomp_copy_kernel,
        out_shape=jax.ShapeDtypeStruct((rows, l_out), x.dtype),
        grid_spec=pltpu.PrefetchScalarGridSpec(
            num_scalar_prefetch=0,
            grid=grid,
            # Time index map stays inside [0, cdiv(l_out, t_tile)), so the
            # chomped input tail is only touched as padding of the last tile.
            in_specs=[pl.BlockSpec((r_tile, t_tile), lambda r, t: (r, t))],
            out_specs=pl.BlockSpec((r_tile, t_tile), lambda r, t: (r, t)),
        ),
        compiler_params=pltpu.CompilerParams(
            dimension_semantics=("parallel", "parallel"),
        ),
    )(x2)

    return out2.reshape(B, C, l_out)


if __name__ == "__main__":
    key = jax.random.PRNGKey(0)
    k1, k2 = jax.random.split(key)

    # Case 1: small TCN-like shapes (batch=2, channels=4, seq=16).
    B, C, L, chomp = 2, 4, 16, 3
    x1 = jax.random.normal(k1, (B, C, L), dtype=jnp.float32)
    y1 = jax.block_until_ready(chomp1d(x1, chomp))
    ref1 = x1[:, :, :-chomp]
    assert y1.shape == (B, C, L - chomp)
    assert y1.dtype == x1.dtype
    assert jnp.array_equal(y1, ref1)

    # Case 2: longer sequence exercising multiple time tiles plus the partial
    # (masked) edge tile: L_out = 2193 -> 2048-lane tile + partial tile.
    B2, C2, L2, chomp2 = 2, 4, 2200, 7
    x2 = jax.random.normal(k2, (B2, C2, L2), dtype=jnp.float32)
    y2 = jax.block_until_ready(chomp1d(x2, chomp2))
    ref2 = x2[:, :, :-chomp2]
    assert y2.shape == ref2.shape
    assert jnp.array_equal(y2, ref2)

    print("KERNEL_OK")
</pallas_src>

<mosaic_0001>
module attributes {stable_mosaic.version = 11 : i64} {
  func.func @_chomp_copy_kernel(%arg0: i32, %arg1: i32, %arg2: memref<8x128xf32, #tpu.memory_space<vmem>>, %arg3: memref<8x128xf32, #tpu.memory_space<vmem>>) attributes {dimension_semantics = [#tpu.dimension_semantics<parallel>, #tpu.dimension_semantics<parallel>], iteration_bounds = array<i64: 1, 1>, scalar_prefetch = 0 : i64, scratch_operands = 0 : i64, tpu.core_type = #tpu.core_type<tc>, window_params = [{transform_indices = @transform_0, window_bounds = array<i64: 8, 128>}, {transform_indices = @transform_1, window_bounds = array<i64: 8, 128>}]} {
    %c0 = arith.constant 0 : index
    %c0_0 = arith.constant 0 : index
    %0 = vector.load %arg2[%c0, %c0_0] : memref<8x128xf32, #tpu.memory_space<vmem>>, vector<8x128xf32>
    %c0_1 = arith.constant 0 : index
    %c0_2 = arith.constant 0 : index
    %1 = vector.load %arg3[%c0_1, %c0_2] : memref<8x128xf32, #tpu.memory_space<vmem>>, vector<8x128xf32>
    tpu.vector_store %arg3[%c0_1, %c0_2], %0 {strides = array<i32>} : memref<8x128xf32, #tpu.memory_space<vmem>>, vector<8x128xf32>,
    return
  }
  func.func @transform_0(%arg0: i32, %arg1: i32) -> (i32, i32) {
    %c0_i32 = arith.constant 0 : i32
    return %arg0, %arg1 : i32, i32
  }
  func.func @transform_1(%arg0: i32, %arg1: i32) -> (i32, i32) {
    %c0_i32 = arith.constant 0 : i32
    return %arg0, %arg1 : i32, i32
  }
}

</mosaic_0001>

<bundles_post_ra>
// kernel: tpu_custom_call.1
= control target key start
LH: loop header
LB: loop body
LE: loop exit
PB: predicated region body
PF: predicated region fallthrough
CT: control target
= control target key end

     0   :  { %6 = vsyncpa [#allocation3], 0  ;;  %s102_s0 = inlined_call_operand.hbm [shape: f32[8,16], index: 0, kind: input, shape index: {}]   ;;  %s103_s1 = inlined_call_operand.hbm [shape: f32[8,13], index: 1, kind: output, shape index: {}]  }
   0x1   :  { %7 = vsyncpa [#allocation4], 0  ;;  %s84_s6 = smov [#allocation2]  }
   0x2   :  { %s14_s7 = sshll.u32 %s84_s6, 4  ;;  %s15_s7 = int_to_ptr.vmem [resolvable:$true] %s14_s7 }
   0x3   :  { %s48_s8 = scalar_lea.vmem %s15_s7, 128  ;;  %p53_p1 = scmp.lt.s32.totalorder %s15_s7, %s15_s7 }
   0x4   :  { %p49_p0 = scmp.ne.s32.totalorder %s15_s7, %s48_s8  ;;  %p54_p2 = scmp.lt.s32.totalorder %s48_s8, %s48_s8 }
   0x6   :  { %p55_p3 = por %p54_p2, %p53_p1 }
   0x8   :  { %p56_p4 = pnand %p55_p3, %p49_p0 }
   0xa   :  { %59 = shalt.err (!%p56_p4)
}
   0xb   :  { %17 = dma.hbm_to_vmem [thread:$0]  %s102_s0, 128, %s15_s7, [#allocation3]  }
   0xc   :  { %80 = dma.done.wait [#allocation3], 128  }
   0xd   :  { %81 = vsyncadd [#allocation3], 4294967168  ;;  %s85_s11 = smov [#allocation5]   ;;  %v21_v0 = vld [vmem:[#allocation2] sm:$0xff] }
   0xe   :  { %s29_s12 = sshll.u32 %s85_s11, 4  ;;  %22 = vst [vmem:[#allocation5] sm:$0xff] %v21_v0  ;;  %s30_s12 = int_to_ptr.vmem [resolvable:$true] %s29_s12 }
   0xf   :  { %s60_s13 = scalar_lea.vmem %s30_s12, 128  ;;  %p65_p6 = scmp.lt.s32.totalorder %s30_s12, %s30_s12 }
  0x10   :  { %p61_p5 = scmp.ne.s32.totalorder %s30_s12, %s60_s13  ;;  %p66_p7 = scmp.lt.s32.totalorder %s60_s13, %s60_s13 }
  0x12   :  { %p67_p8 = por %p66_p7, %p65_p6 }
  0x14   :  { %p68_p9 = pnand %p67_p8, %p61_p5 }
  0x16   :  { %71 = shalt.err (!%p68_p9)
}
  0x17   :  { %32 = dma.vmem_to_hbm [thread:$0]  %s30_s12, 128, %s103_s1, [#allocation4]  }
  0x18   :  { %82 = dma.done.wait [#allocation4], 128  }
  0x19   :  { %83 = vsyncadd [#allocation4], 4294967168 }
  0x1a   :  { %36 = vsyncpa [#allocation3], 1 }
  0x1b   :  { %37 = vsyncpa [#allocation4], 1 }

</bundles_post_ra>
